<compile_context>
chip_gen: v7x
topology: tpu7x:2x2x1
jax: 0.10.0
libtpu: 0.0.40
codegen_flags: <defaults>
</compile_context>

<pallas_src>
import jax
import jax.numpy as jnp
from jax.experimental import pallas as pl
from jax.experimental.pallas import tpu as pltpu


def _round_up(x, m):
    return (x + m - 1) // m * m


def noise_layer_kernel(x_ref, w_ref, n_ref, o_ref):
    # x_ref: (1, C, TL), w_ref: (1, C, 1), n_ref: (1, 1, TL)
    # broadcast: per-channel weight * per-position noise, added to x.
    o_ref[...] = x_ref[...] + w_ref[...] * n_ref[...]


def _choose_tile(C, L, itemsize, vmem_budget_bytes=24 << 20, tl_cap=8192):
    """Pick a lane tile TL (multiple of 128) and the padded length L_pad.

    Per-grid-step VMEM (double-buffered x-in, out, noise, weight) is roughly
    (2*C*TL + 2*C*TL + 2*TL + 2*C) * itemsize ~= 4*C*TL*itemsize; keep that
    under `vmem_budget_bytes` so the kernel fits comfortably on v7x as well.
    """
    L128 = _round_up(L, 128)
    tl_from_vmem = vmem_budget_bytes // (4 * C * itemsize)
    tl_max = max(128, min(tl_cap, (tl_from_vmem // 128) * 128))
    n_chunks = pl.cdiv(L128, tl_max)
    TL = _round_up(pl.cdiv(L128, n_chunks), 128)
    L_pad = TL * n_chunks
    return TL, L_pad, n_chunks


def noise_layer(x, weight, noise, *, donate_x=False):
    """x: (B, C, L), weight: (1, C, 1), noise: (B, 1, L) -> (B, C, L)."""
    B, C, L = x.shape
    itemsize = jnp.dtype(x.dtype).itemsize
    TL, L_pad, n_l = _choose_tile(C, L, itemsize)

    if L_pad != L:
        pad = [(0, 0), (0, 0), (0, L_pad - L)]
        x_in = jnp.pad(x, pad)
        n_in = jnp.pad(noise, pad)
    else:
        x_in, n_in = x, noise

    out = pl.pallas_call(
        noise_layer_kernel,
        out_shape=jax.ShapeDtypeStruct((B, C, L_pad), x.dtype),
        grid_spec=pltpu.PrefetchScalarGridSpec(
            num_scalar_prefetch=0,
            grid=(B, n_l),
            in_specs=[
                pl.BlockSpec((1, C, TL), lambda b, l: (b, 0, l)),  # x tile
                pl.BlockSpec((1, C, 1), lambda b, l: (0, 0, 0)),   # weight (resident)
                pl.BlockSpec((1, 1, TL), lambda b, l: (b, 0, l)),  # noise tile
            ],
            out_specs=pl.BlockSpec((1, C, TL), lambda b, l: (b, 0, l)),
        ),
        compiler_params=pltpu.CompilerParams(
            dimension_semantics=("parallel", "parallel"),
            vmem_limit_bytes=48 << 20,
        ),
        # Optionally reuse x's HBM buffer for the output when the caller no
        # longer needs x (halves the op's HBM footprint).
        input_output_aliases=({0: 0} if donate_x else {}),
    )(x_in, weight, n_in)

    if L_pad != L:
        out = out[:, :, :L]
    return out


def noise_layer_forward(x, weight, key, noise=None):
    """Default forward path: noise=None -> noise = 0.2 * randn(B, 1, L)."""
    B, _, L = x.shape
    if noise is None:
        # Sample in f32 then cast to x.dtype (f32-quality Gaussian even for bf16 x).
        noise = (0.2 * jax.random.normal(key, (B, 1, L), dtype=jnp.float32)).astype(x.dtype)
    # TODO(synk): optionally fuse RNG into the kernel (pltpu.prng_seed +
    # pltpu.stateful_normal per (1,1,TL) tile) to skip the noise HBM round-trip.
    return noise_layer(x, weight, noise), noise


if __name__ == "__main__":
    key = jax.random.PRNGKey(0)
    k_x, k_w, k_n, k_x2, k_n2 = jax.random.split(key, 5)

    # Small shapes consistent with the module spec (x = randn(1, 16, 128)).
    B, C, L = 2, 16, 128
    x = jax.random.normal(k_x, (B, C, L), dtype=jnp.float32)
    # Module __init__ uses zeros(1, channels, 1); use a deterministic nonzero
    # weight so the broadcast path is actually exercised/verified.
    weight = 0.1 * jax.random.normal(k_w, (1, C, 1), dtype=jnp.float32)

    out, noise = noise_layer_forward(x, weight, k_n)
    out = jax.block_until_ready(out)
    ref = x + weight * noise
    assert out.shape == (B, C, L)
    assert jnp.allclose(out, ref, atol=1e-6, rtol=1e-6)

    # Second check: L not a multiple of 128 exercises the lane-padding path.
    L2 = 200
    x2 = jax.random.normal(k_x2, (B, C, L2), dtype=jnp.float32)
    noise2 = 0.2 * jax.random.normal(k_n2, (B, 1, L2), dtype=jnp.float32)
    out2 = jax.block_until_ready(noise_layer(x2, weight, noise2))
    ref2 = x2 + weight * noise2
    assert out2.shape == (B, C, L2)
    assert jnp.allclose(out2, ref2, atol=1e-6, rtol=1e-6)

    print("KERNEL_OK")
</pallas_src>

<mosaic_0001>
module attributes {stable_mosaic.version = 11 : i64} {
  func.func @noise_layer_kernel(%arg0: i32, %arg1: i32, %arg2: memref<1x16x128xf32, #tpu.memory_space<vmem>>, %arg3: memref<1x16x1xf32, #tpu.memory_space<vmem>>, %arg4: memref<1x1x128xf32, #tpu.memory_space<vmem>>, %arg5: memref<1x16x128xf32, #tpu.memory_space<vmem>>) attributes {dimension_semantics = [#tpu.dimension_semantics<parallel>, #tpu.dimension_semantics<parallel>], iteration_bounds = array<i64: 2, 1>, scalar_prefetch = 0 : i64, scratch_operands = 0 : i64, tpu.core_type = #tpu.core_type<tc>, window_params = [{transform_indices = @transform_0, window_bounds = array<i64: 1, 16, 128>}, {pipeline_mode = #tpu.pipeline_mode<synchronous>, transform_indices = @transform_1, window_bounds = array<i64: 1, 16, 1>}, {transform_indices = @transform_2, window_bounds = array<i64: 1, 1, 128>}, {transform_indices = @transform_3, window_bounds = array<i64: 1, 16, 128>}]} {
    %c0 = arith.constant 0 : index
    %c0_0 = arith.constant 0 : index
    %c0_1 = arith.constant 0 : index
    %0 = vector.load %arg2[%c0, %c0_0, %c0_1] : memref<1x16x128xf32, #tpu.memory_space<vmem>>, vector<1x16x128xf32>
    %c0_2 = arith.constant 0 : index
    %c0_3 = arith.constant 0 : index
    %c0_4 = arith.constant 0 : index
    %1 = vector.load %arg3[%c0_2, %c0_3, %c0_4] : memref<1x16x1xf32, #tpu.memory_space<vmem>>, vector<1x16x1xf32>
    %c0_5 = arith.constant 0 : index
    %c0_6 = arith.constant 0 : index
    %c0_7 = arith.constant 0 : index
    %2 = vector.load %arg4[%c0_5, %c0_6, %c0_7] : memref<1x1x128xf32, #tpu.memory_space<vmem>>, vector<1x1x128xf32>
    %3 = vector.broadcast %1 : vector<1x16x1xf32> to vector<1x16x128xf32>
    %4 = vector.broadcast %2 : vector<1x1x128xf32> to vector<1x16x128xf32>
    %5 = arith.mulf %3, %4 : vector<1x16x128xf32>
    %6 = arith.addf %0, %5 : vector<1x16x128xf32>
    %c0_8 = arith.constant 0 : index
    %c0_9 = arith.constant 0 : index
    %c0_10 = arith.constant 0 : index
    %7 = vector.load %arg5[%c0_8, %c0_9, %c0_10] : memref<1x16x128xf32, #tpu.memory_space<vmem>>, vector<1x16x128xf32>
    tpu.vector_store %arg5[%c0_8, %c0_9, %c0_10], %6 {strides = array<i32>} : memref<1x16x128xf32, #tpu.memory_space<vmem>>, vector<1x16x128xf32>,
    return
  }
  func.func @transform_0(%arg0: i32, %arg1: i32) -> (i32, i32, i32) {
    %c0_i32 = arith.constant 0 : i32
    %c0_i32_0 = arith.constant 0 : i32
    return %arg0, %c0_i32, %arg1 : i32, i32, i32
  }
  func.func @transform_1(%arg0: i32, %arg1: i32) -> (i32, i32, i32) {
    %c0_i32 = arith.constant 0 : i32
    %c0_i32_0 = arith.constant 0 : i32
    %c0_i32_1 = arith.constant 0 : i32
    %c0_i32_2 = arith.constant 0 : i32
    return %c0_i32, %c0_i32_0, %c0_i32_1 : i32, i32, i32
  }
  func.func @transform_2(%arg0: i32, %arg1: i32) -> (i32, i32, i32) {
    %c0_i32 = arith.constant 0 : i32
    %c0_i32_0 = arith.constant 0 : i32
    return %arg0, %c0_i32, %arg1 : i32, i32, i32
  }
  func.func @transform_3(%arg0: i32, %arg1: i32) -> (i32, i32, i32) {
    %c0_i32 = arith.constant 0 : i32
    %c0_i32_0 = arith.constant 0 : i32
    return %arg0, %c0_i32, %arg1 : i32, i32, i32
  }
}

</mosaic_0001>

<bundles_post_ra>
// kernel: tpu_custom_call.1
= control target key start
LH: loop header
LB: loop body
LE: loop exit
PB: predicated region body
PF: predicated region fallthrough
CT: control target
= control target key end

     0   :  { %8 = vsyncpa [#allocation3], 0  ;;  %s783_s0 = inlined_call_operand.hbm [shape: f32[2,16,128], index: 0, kind: input, shape index: {}]   ;;  %s784_s1 = inlined_call_operand.vmem [shape: f32[1,16,1], index: 1, kind: input, shape index: {}]   ;;  %s785_s2 = inlined_call_operand.vmem [shape: f32[2,1,128], index: 2, kind: input, shape index: {}]   ;;  %s786_s3 = inlined_call_operand.hbm [shape: f32[2,16,128], index: 3, kind: output, shape index: {}]  }
   0x1   :  { %10 = vsyncpa [#allocation3 + $0x1], 0 }
   0x2   :  { %11 = vsyncpa [#allocation4], 0 }
   0x3   :  { %13 = vsyncpa [#allocation4 + $0x1], 0  ;;  %s597_s12 = smov 0   ;;  %s599_s13 = smov 0  }
   0x4   :  { %s601_s14 = smov 0   ;;  %s603_s15 = smov 0  }
   0x5   :  { %s605_s16 = smov 0   ;;  %s607_s17 = smov 0  }
   0x6 LB: > { %s370_s18 = sadd.s32 4294967295, %s568_s17   ;;  %s371_s19 = sadd.s32 4294967294, %s568_s17   ;;  %s568_s17 = sphi %s607_s17, %s19_s17   ;;  %s564_s16 = sphi %s605_s16, %s801_s16   ;;  %s560_s15 = sphi %s603_s15, %s800_s15   ;;  %s556_s14 = sphi %s601_s14, %s799_s14   ;;  %s552_s13 = sphi %s599_s13, %s798_s13   ;;  %s548_s12 = sphi %s597_s12, %s797_s12  }
   0x7   : > { %s31_s20 = sadd.s32 1, %s564_s16  ;;  %s40_s21 = sadd.s32 1, %s556_s14 }
   0x8   : > { %p33_p0 = scmp.ge.s32.totalorder %s31_s20, 2  ;;  %p47_p1 = scmp.ne.s32.totalorder %s556_s14, %s552_s13 }
   0x9   : > { %p48_p2 = scmp.eq.s32.totalorder %s568_s17, 0  ;;  %p53_p3 = scmp.ne.s32.totalorder %s552_s13, %s548_s12 }
   0xa   : > { %s803_s20 = smov (%p33_p0, %s31_s20), 0  ;;  %p54_p5 = scmp.eq.s32.totalorder %s370_s18, 0 }
   0xb   : > { %p638_p4 = por %p48_p2, %p47_p1  ;;  %s35_s23 = ssub.s32 %s564_s16, %s803_s20 }
   0xc   : > { %p128_p6 = scmp.eq.s32.totalorder %s370_s18, 1  ;;  %p38_p7 = scmp.eq.s32.totalorder %s35_s23, 0 }
   0xd   : > { %p644_p8 = por %p54_p5, %p53_p3  ;;  %p134_p10 = scmp.eq.s32.totalorder %s371_s19, 1 }
   0xe   : > { %p648_p9 = por %p128_p6, %p47_p1  ;;  %p400_p13 = scmp.lt.s32.totalorder %s568_s17, 2 }
   0xf   : > { %s653_s26 = scalar_select %p38_p7, %s556_s14, %s40_s21  }
  0x10   : > { %s790_s25 = scalar_select %p648_p9, 1, 0 }
  0x11   : > { %p655_p11 = por %p134_p10, %p53_p3  ;;  %s157_s28 = sand.u32 1, %s556_s14  }
  0x12   : > { %s374_s29 = sshll.u32 %s157_s28, 4  ;;  %s386_s30 = sshll.u32 %s564_s16, 8 }
  0x13   : > { %s791_s27 = scalar_select %p655_p11, 1, 0 }
  0x14   : > { %s666_s6 = scalar_lea.hbm %s783_s0, %s386_s30  ;;  %s161_s7 = scalar_lea.vmem [#allocation2], %s374_s29 }
  0x15   : > { %s169_s8 = sshll.u32 %s161_s7, 4  ;;  %p672_p0 = pnand %p400_p13, %p638_p4  ;;  %s668_s8 = int_to_ptr.vmem [resolvable:$true] %s169_s8 }
  0x16   : > { %s677_s10 = scalar_lea.sflag [#allocation3], %s157_s28  ;;  %s456_s11 = scalar_lea.hbm %s666_s6, 256 }
  0x17   : > { %p457_p2 = scmp.ne.s32.totalorder %s666_s6, %s456_s11  ;;  %p458_p3 = pneg %p672_p0 }
  0x18   : > { %s461_s21 = scalar_lea.hbm %s783_s0, 512  ;;  %p462_p4 = scmp.lt.u32.totalorder %s666_s6, %s783_s0 }
  0x19   : > { %p459_p5 = pnand %p458_p3, %p457_p2  ;;  %p463_p7 = scmp.lt.u32.totalorder %s461_s21, %s456_s11 }
  0x1a   : > { %p465_p13 = scmp.lt.u32.totalorder %s456_s11, %s666_s6 }
  0x1b   : > { %p460_p6 = pneg %p459_p5  ;;  %p464_p10 = por %p463_p7, %p462_p4 }
  0x1d   : > { %p466_p12 = por %p465_p13, %p464_p10 }
  0x1f   : > { %p467_p1 = pnand %p466_p12, %p460_p6 }
  0x21   : > { %470 = shalt.err (!%p467_p1)
}
  0x22   : > { %s471_s28 = scalar_lea.vmem %s668_s8, 256  ;;  %s570_s29 = smov [#allocation2]  }
  0x23   : > { %p472_p2 = scmp.ne.s32.totalorder %s668_s8, %s471_s28  ;;  %s476_s30 = sshll.u32 %s570_s29, 4  ;;  %s477_s30 = int_to_ptr.vmem [resolvable:$false] %s476_s30 }
  0x24   : > { %s478_s4 = scalar_lea.vmem %s477_s30, 512  ;;  %p479_p9 = scmp.lt.s32.totalorder %s668_s8, %s477_s30 }
  0x25   : > { %p474_p5 = pnand %p472_p2, %p458_p3  ;;  %p480_p4 = scmp.lt.s32.totalorder %s478_s4, %s471_s28 }
  0x27   : > { %p475_p11 = pneg %p474_p5  ;;  %p481_p7 = por %p480_p4, %p479_p9 }
  0x29   : > { %p482_p10 = pnand %p481_p7, %p475_p11 }
  0x2b   : > { %485 = shalt.err (!%p482_p10)
}
  0x2c   : > { %s571_s5 = smov 128   ;;  %s572_s7 = smov 8  }
  0x2d   : > { %395 = dma.hbm_to_vmem [thread:$0]  (!%p672_p0), %s666_s6, 256, %s668_s8, %s677_s10, %s571_s5, %s571_s5, %s572_s7  }
  0x2e   : > { %p186_p12 = scmp.lt.s32.totalorder %s568_s17, 3  ;;  %p793_p1 = scmp.ge.s32.totalorder %s568_s17, 1 }
  0x30   : > { %p187_p3 = pnand %p793_p1, %p186_p12 }
  0x31   : > { %s709_s11 = sand.u32 (!%p187_p3), 1, %s552_s13  }
  0x32   : > { %190 = sbr.rel (%p187_p3) target bundleno = 211 (0xd3), region = 32  ;;  %s378_s18 = sshll.u32 (!%p187_p3), %s709_s11, 4 }
  0x33   : > { %s193_s19 = scalar_lea.sflag (!%p187_p3), [#allocation3], %s709_s11  ;;  %s196_s21 = scalar_lea.vmem (!%p187_p3), [#allocation2], %s378_s18 }
  0x39   : > { %539 = dma.done.wait (%p644_p8), %s193_s19, 256  }
  0x3a   : > { %541 = vsyncadd (%p644_p8), %s193_s19, 4294967040  ;;  %v573_v0 = vmov 0   ;;  %v233_v1 = vld [vmem:[%s784_s1] sm:$0xff]  ;;  %v234_v2 = vld [vmem:[%s784_s1 + $0x8] sm:$0xff]  ;;  %p225_p9 = scmp.lt.s32.totalorder %s560_s15, 1  ;;  %s224_s29 = scalar_lea.vmem [#allocation5], %s378_s18 }
  0x3b   : > { %455 = vset.pattern.permute.xlu0 %v573_v0  ;;  %v231_v5 = vld [vmem:[%s196_s21] sm:$0xff]  ;;  %s273_s30 = sshll.u32 %s224_s29, 4  ;;  %s387_s4 = sshll.u32 %s560_s15, 8  ;;  %v232_v9 = vld [vmem:[%s196_s21 + $0x8] sm:$0xff]  ;;  %s729_s30 = int_to_ptr.vmem [resolvable:$true] %s273_s30 }
  0x3c   : > { %238 = vperm.xlu0 %455, %v233_v1   ;;  %s226_s22 = scalar_select %p225_p9, %s560_s15, 1 }
  0x3d   : > { %s734_s19 = scalar_lea.hbm %s786_s3, %s387_s4  ;;  %s259_s18 = scalar_lea.sflag [#allocation4], %s709_s11 }
  0x3e   : > { %s230_s28 = scalar_lea.vmem %s785_s2, %s226_s22  ;;  %s486_s6 = scalar_lea.vmem %s729_s30, 256 }
  0x3f   : > { %v380_v3 = vld [vmem:[%s230_s28] ss:$0 sm:$0xff]  ;;  %p487_p8 = scmp.ne.s32.totalorder %s729_s30, %s486_s6  ;;  %p794_p11 = scmp.ne.s32.totalorder %s790_s25, 0 }
  0x40   : > { %243 = vperm.xlu0 %455, %v234_v2   ;;  %s574_s15 = smov [#allocation5]  }
  0x41   : > { %p488_p0 = pnand %p487_p8, %p794_p11  ;;  %s490_s21 = sshll.u32 %s574_s15, 4  ;;  %s491_s21 = int_to_ptr.vmem [resolvable:$false] %s490_s21 }
  0x42   : > { %s492_s8 = scalar_lea.vmem %s491_s21, 512  ;;  %p493_p13 = scmp.lt.s32.totalorder %s729_s30, %s491_s21 }
  0x43   : > { %p489_p6 = pneg %p488_p0  ;;  %p494_p2 = scmp.lt.s32.totalorder %s492_s8, %s486_s6 }
  0x45   : > { %p495_p5 = por %p494_p2, %p493_p13 }
  0x47   : > { %p496_p4 = pnand %p495_p5, %p489_p6 }
  0xbb   : > { %v239_v4 = vpop.permute.xlu0 %238 }
  0xbc   : > { %v252_v6 = vmul.f32 %v380_v3, %v239_v4 }
  0xbe   : > { %v254_v7 = vadd.f32 %v252_v6, %v231_v5 }
  0xbf   : > { %v244_v8 = vpop.permute.xlu0 %243 }
  0xc0   : > { %256 = vst [vmem:[%s224_s29] sm:$0xff] %v254_v7  ;;  %v253_v10 = vmul.f32 %v380_v3, %v244_v8 }
  0xc2   : > { %v255_v11 = vadd.f32 %v253_v10, %v232_v9 }
  0xc4   : > { %257 = vst [vmem:[%s224_s29 + $0x8] sm:$0xff] %v255_v11 }
  0xc5   : > { %499 = shalt.err (!%p496_p4)
}
  0xc6   : > { %s500_s9 = scalar_lea.hbm %s734_s19, 256  ;;  %s504_s23 = scalar_lea.hbm %s786_s3, 512 }
  0xc7   : > { %p501_p7 = scmp.ne.s32.totalorder %s734_s19, %s500_s9  ;;  %p505_p1 = scmp.lt.u32.totalorder %s734_s19, %s786_s3 }
  0xc8   : > { %p506_p3 = scmp.lt.u32.totalorder %s504_s23, %s500_s9  ;;  %p508_p8 = scmp.lt.u32.totalorder %s500_s9, %s734_s19 }
  0xc9   : > { %p502_p10 = pnand %p501_p7, %p794_p11 }
  0xca   : > { %p507_p9 = por %p506_p3, %p505_p1 }
  0xcb   : > { %p503_p12 = pneg %p502_p10 }
  0xcc   : > { %p509_p0 = por %p508_p8, %p507_p9 }
  0xce   : > { %p510_p6 = pnand %p509_p0, %p503_p12 }
  0xd0   : > { %513 = shalt.err (!%p510_p6)
}
  0xd1   : > { %s575_s29 = smov 128   ;;  %s576_s4 = smov 8  }
  0xd2   : > { %390 = dma.vmem_to_hbm [thread:$0]  (%p794_p11), %s729_s30, 256, %s734_s19, %s259_s18, %s575_s29, %s575_s29, %s576_s4  }
  0xd3 PF: > { %s288_s5 = sand.u32 1, %s548_s12   ;;  %p795_p13 = scmp.ne.s32.totalorder %s791_s27, 0 }
  0xd4   : > { %p796_p2 = scmp.ge.s32.totalorder %s568_s17, 2  ;;  %s289_s7 = scalar_lea.sflag [#allocation4], %s288_s5 }
  0xd6   : > { %p397_p5 = pnand %p796_p2, %p795_p13 }
  0xd8   : > { %543 = dma.done.wait (!%p397_p5), %s289_s7, 256  }
  0xd9   : > { %545 = vsyncadd (!%p397_p5), %s289_s7, 4294967040  ;;  %s19_s17 = sadd.s32 1, %s568_s17   ;;  %s797_s12 = smov %s552_s13 }
  0xda   : > { %p16_p4 = scmp.ge.s32.totalorder %s19_s17, 4   ;;  %s798_s13 = smov %s556_s14 }
  0xdb   : > { %s799_s14 = smov %s653_s26  ;;  %s800_s15 = smov %s564_s16 }
  0xdc   : > { %s801_s16 = smov %s803_s20  ;;  %18 = sbr.rel (!%p16_p4) target bundleno = 6 (0x6), region = 80 }
  0xe3   :  { %294 = vsyncpa [#allocation3], 1 }
  0xe4   :  { %296 = vsyncpa [#allocation3 + $0x1], 1 }
  0xe5   :  { %297 = vsyncpa [#allocation4], 1 }
  0xe6   :  { %299 = vsyncpa [#allocation4 + $0x1], 1 }

</bundles_post_ra>
